<compile_context>
chip_gen: v6e
topology: v6e:2x2x1
jax: 0.10.0
libtpu: 0.0.40
codegen_flags: <defaults>
</compile_context>

<pallas_src>
import jax
import jax.numpy as jnp
from jax.experimental import pallas as pl
from jax.experimental.pallas import tpu as pltpu

LANE = 128      # vreg lane width
SUBLANE = 8     # f32 sublane count


def _round_up(x, m):
    return ((x + m - 1) // m) * m


def _cdiv(a, b):
    return (a + b - 1) // b


# ---------------------------------------------------------------------------
# Kernel: fc1 -> ReLU -> fc2 -> ReLU -> fc3 -> ReLU -> fc4'
# (dueling combine already folded into fc4' in the wrapper)
# ---------------------------------------------------------------------------
def mlp_fused_kernel(x_ref, w1_ref, b1_ref, w2_ref, b2_ref,
                     w3_ref, b3_ref, w4_ref, b4_ref, o_ref):
    # x is already stored in the compute dtype; the astype is a no-op then and
    # a guard otherwise.  All dots accumulate in f32 on the MXU; bias + ReLU
    # stay in f32 on the VPU (v5e has no bf16 VALU path).
    h = jnp.dot(x_ref[...].astype(w1_ref.dtype), w1_ref[...],
                preferred_element_type=jnp.float32)
    h = jnp.maximum(h + b1_ref[...], 0.0)

    h = jnp.dot(h.astype(w2_ref.dtype), w2_ref[...],
                preferred_element_type=jnp.float32)
    h = jnp.maximum(h + b2_ref[...], 0.0)

    h = jnp.dot(h.astype(w3_ref.dtype), w3_ref[...],
                preferred_element_type=jnp.float32)
    h = jnp.maximum(h + b3_ref[...], 0.0)

    q = jnp.dot(h.astype(w4_ref.dtype), w4_ref[...],
                preferred_element_type=jnp.float32)
    o_ref[...] = (q + b4_ref[...]).astype(o_ref.dtype)


# ---------------------------------------------------------------------------
# One-time parameter prep: fold dueling 'avg' into fc4, pad to lane width.
# ---------------------------------------------------------------------------
def prepare_params(params, action_dim, compute_dtype=jnp.bfloat16):
    """bf16 weights by default (native MXU rate, half the streamed bytes);
    pass compute_dtype=jnp.float32 for a bit-tight path."""
    w1, b1, w2, b2, w3, b3, w4, b4 = params

    # out[:, j] = q[:, 0] + q[:, 1+j] - mean_k q[:, 1+k]  is linear in q,
    # so fold it into fc4's weight/bias columns.
    wv, wa = w4[:, 0:1], w4[:, 1:]
    bv, ba = b4[:, 0:1], b4[:, 1:]
    w4f = wv + wa - jnp.mean(wa, axis=1, keepdims=True)
    b4f = bv + ba - jnp.mean(ba, axis=1, keepdims=True)

    d_in, hidden = w1.shape
    d_in_p = _round_up(d_in, LANE)
    h_p = _round_up(hidden, LANE)
    a_p = _round_up(action_dim, LANE)

    def pad2(m, rows, cols):
        return jnp.pad(m, ((0, rows - m.shape[0]), (0, cols - m.shape[1])))

    w1p = pad2(w1, d_in_p, h_p).astype(compute_dtype)
    w2p = pad2(w2, h_p, h_p).astype(compute_dtype)
    w3p = pad2(w3, h_p, h_p).astype(compute_dtype)
    w4p = pad2(w4f, h_p, a_p).astype(compute_dtype)
    b1p = pad2(b1, 1, h_p)          # biases stay f32 (added post-accumulate)
    b2p = pad2(b2, 1, h_p)
    b3p = pad2(b3, 1, h_p)
    b4p = pad2(b4f, 1, a_p)

    return (w1p, b1p, w2p, b2p, w3p, b3p, w4p, b4p), d_in_p, a_p


# ---------------------------------------------------------------------------
# Wrapper: batch-blocked pallas_call with single-buffered VMEM-resident weights.
# ---------------------------------------------------------------------------
def mlp_model_forward(x, prepared, action_dim, *, max_tile_b=512):
    """x: [B, hist_len, state_shape]. Returns [B, action_dim] float32."""
    (w1, b1, w2, b2, w3, b3, w4, b4), d_in_p, a_p = prepared
    hid_p = w1.shape[1]
    compute_dtype = w1.dtype

    B = x.shape[0]
    d_in = x.shape[1] * x.shape[2]
    # Same flatten as torch x.view(B, -1); cast once so fc1 runs at native
    # compute-dtype MXU rate and the x-tile DMA is half width in bf16.
    x2d = x.reshape(B, d_in).astype(compute_dtype)

    # Tile-count policy:
    #   * cap padding waste at <= one sublane group per tile (tile derived
    #     from B, not a fixed 512), and
    #   * give the grid >=2 iterations once B > SUBLANE so v7x can shard the
    #     "parallel" batch axis across its 2 TensorCores.
    n_tiles = max(_cdiv(B, max_tile_b), min(2, _cdiv(B, SUBLANE)))
    tile_b = _round_up(_cdiv(B, n_tiles), SUBLANE)
    b_pad = tile_b * n_tiles
    x2d = jnp.pad(x2d, ((0, b_pad - B), (0, d_in_p - d_in)))

    # Explicit scoped-VMEM budget: double-buffered x/out tiles +
    # single-buffered weights + f32 biases + f32 intermediates, 1.5x headroom,
    # clamped to [16 MiB, 64 MiB] (v7x physical ceiling).
    w_isz = jnp.dtype(compute_dtype).itemsize
    vmem = (2 * tile_b * d_in_p * w_isz                      # x tiles
            + 2 * tile_b * a_p * 4                           # out tiles
            + (d_in_p * hid_p + 2 * hid_p * hid_p + hid_p * a_p) * w_isz
            + (3 * hid_p + a_p) * 4                          # biases
            + 3 * tile_b * hid_p * 4)                        # f32 intermediates
    vmem = min(max(int(vmem * 1.5) + (4 << 20), 16 << 20), 64 << 20)

    def x_map(i):
        return (i, 0)

    def const_map(i):                 # weights stay VMEM-resident across tiles
        return (0, 0)

    def w_spec(shape):
        # Fetched once, never revisited -> single buffer (halves weight VMEM).
        return pl.BlockSpec(shape, const_map, pipeline_mode=pl.Buffered(1))

    out = pl.pallas_call(
        mlp_fused_kernel,
        out_shape=jax.ShapeDtypeStruct((b_pad, a_p), jnp.float32),
        grid=(n_tiles,),
        in_specs=[
            pl.BlockSpec((tile_b, d_in_p), x_map),   # x tile (double-buffered)
            w_spec((d_in_p, hid_p)),                 # w1
            w_spec((1, hid_p)),                      # b1
            w_spec((hid_p, hid_p)),                  # w2
            w_spec((1, hid_p)),                      # b2
            w_spec((hid_p, hid_p)),                  # w3
            w_spec((1, hid_p)),                      # b3
            w_spec((hid_p, a_p)),                    # w4 (dueling folded)
            w_spec((1, a_p)),                        # b4 (dueling folded)
        ],
        out_specs=pl.BlockSpec((tile_b, a_p), x_map),
        compiler_params=pltpu.CompilerParams(
            dimension_semantics=("parallel",),       # v7x: shard over 2 TCs
            vmem_limit_bytes=vmem),
    )(x2d, w1, b1, w2, b2, w3, b3, w4, b4)

    return out[:B, :action_dim]


# ---------------------------------------------------------------------------
# Init + pure-JAX reference (matches PyTorch MlpModel, dueling_type='avg').
# ---------------------------------------------------------------------------
def init_params(key, d_in, hidden, action_dim):
    """Deterministic PyTorch-nn.Linear-style init; weights stored as [in, out]."""
    def linear(key, fan_in, fan_out):
        kw, kb = jax.random.split(key)
        bound = 1.0 / jnp.sqrt(fan_in)
        w = jax.random.uniform(kw, (fan_in, fan_out), jnp.float32, -bound, bound)
        b = jax.random.uniform(kb, (1, fan_out), jnp.float32, -bound, bound)
        return w, b

    k1, k2, k3, k4 = jax.random.split(key, 4)
    w1, b1 = linear(k1, d_in, hidden)
    w2, b2 = linear(k2, hidden, hidden)
    w3, b3 = linear(k3, hidden, hidden)
    w4, b4 = linear(k4, hidden, action_dim + 1)   # dueling head: [V | A]
    return (w1, b1, w2, b2, w3, b3, w4, b4)


def mlp_reference(x, params):
    w1, b1, w2, b2, w3, b3, w4, b4 = params
    h = x.reshape(x.shape[0], -1)
    h = jnp.maximum(h @ w1 + b1, 0.0)
    h = jnp.maximum(h @ w2 + b2, 0.0)
    h = jnp.maximum(h @ w3 + b3, 0.0)
    q = h @ w4 + b4
    v, a = q[:, 0:1], q[:, 1:]
    return v + a - jnp.mean(a, axis=1, keepdims=True)


if __name__ == "__main__":
    # Small config consistent with the module: hist_len=4, state_shape=16,
    # hidden_dim=32, action_dim=6, enable_dueling=True, dueling_type='avg'.
    B, hist_len, state_shape = 2, 4, 16
    hidden_dim, action_dim = 32, 6
    d_in = hist_len * state_shape

    key = jax.random.PRNGKey(0)
    kx, kp = jax.random.split(key)
    x = jax.random.normal(kx, (B, hist_len, state_shape), jnp.float32)
    params = init_params(kp, d_in, hidden_dim, action_dim)
    ref = mlp_reference(x, params)

    # Default bf16 compute path (native MXU rate, half the streamed bytes).
    prep_bf16 = prepare_params(params, action_dim, compute_dtype=jnp.bfloat16)
    out_bf16 = jax.block_until_ready(mlp_model_forward(x, prep_bf16, action_dim))
    assert out_bf16.shape == (B, action_dim)
    assert jnp.allclose(out_bf16, ref, atol=5e-2, rtol=5e-2), \
        "bf16 path mismatch vs reference"

    # Tight f32 path for a strict numerical check.
    prep_f32 = prepare_params(params, action_dim, compute_dtype=jnp.float32)
    out_f32 = jax.block_until_ready(mlp_model_forward(x, prep_f32, action_dim))
    assert out_f32.shape == (B, action_dim)
    assert jnp.allclose(out_f32, ref, atol=1e-5, rtol=1e-5), \
        "f32 path mismatch vs reference"

    print("KERNEL_OK")
</pallas_src>

<mosaic_0001>
module attributes {stable_mosaic.version = 11 : i64} {
  func.func @mlp_fused_kernel(%arg0: i32, %arg1: memref<8x128xbf16, #tpu.memory_space<vmem>>, %arg2: memref<128x128xbf16, #tpu.memory_space<vmem>>, %arg3: memref<1x128xf32, #tpu.memory_space<vmem>>, %arg4: memref<128x128xbf16, #tpu.memory_space<vmem>>, %arg5: memref<1x128xf32, #tpu.memory_space<vmem>>, %arg6: memref<128x128xbf16, #tpu.memory_space<vmem>>, %arg7: memref<1x128xf32, #tpu.memory_space<vmem>>, %arg8: memref<128x128xbf16, #tpu.memory_space<vmem>>, %arg9: memref<1x128xf32, #tpu.memory_space<vmem>>, %arg10: memref<8x128xf32, #tpu.memory_space<vmem>>) attributes {dimension_semantics = [#tpu.dimension_semantics<parallel>], iteration_bounds = array<i64: 1>, scalar_prefetch = 0 : i64, scratch_operands = 0 : i64, tpu.core_type = #tpu.core_type<tc>, window_params = [{transform_indices = @transform_0, window_bounds = array<i64: 8, 128>}, {pipeline_mode = #tpu.pipeline_mode<synchronous>, transform_indices = @transform_1, window_bounds = array<i64: 128, 128>}, {pipeline_mode = #tpu.pipeline_mode<synchronous>, transform_indices = @transform_2, window_bounds = array<i64: 1, 128>}, {pipeline_mode = #tpu.pipeline_mode<synchronous>, transform_indices = @transform_3, window_bounds = array<i64: 128, 128>}, {pipeline_mode = #tpu.pipeline_mode<synchronous>, transform_indices = @transform_4, window_bounds = array<i64: 1, 128>}, {pipeline_mode = #tpu.pipeline_mode<synchronous>, transform_indices = @transform_5, window_bounds = array<i64: 128, 128>}, {pipeline_mode = #tpu.pipeline_mode<synchronous>, transform_indices = @transform_6, window_bounds = array<i64: 1, 128>}, {pipeline_mode = #tpu.pipeline_mode<synchronous>, transform_indices = @transform_7, window_bounds = array<i64: 128, 128>}, {pipeline_mode = #tpu.pipeline_mode<synchronous>, transform_indices = @transform_8, window_bounds = array<i64: 1, 128>}, {transform_indices = @transform_9, window_bounds = array<i64: 8, 128>}]} {
    %c0 = arith.constant 0 : index
    %c0_0 = arith.constant 0 : index
    %0 = vector.load %arg1[%c0, %c0_0] : memref<8x128xbf16, #tpu.memory_space<vmem>>, vector<8x128xbf16>
    %c0_1 = arith.constant 0 : index
    %c0_2 = arith.constant 0 : index
    %1 = vector.load %arg2[%c0_1, %c0_2] : memref<128x128xbf16, #tpu.memory_space<vmem>>, vector<128x128xbf16>
    %cst = arith.constant dense<0.000000e+00> : vector<8x128xf32>
    %2 = tpu.matmul %0, %1, %cst {dimension_numbers = #tpu.dot_dimension_numbers<[1], [0], [0], [1], [0, 0, 1, 1], [], []>} : vector<8x128xbf16>, vector<128x128xbf16>, vector<8x128xf32> -> vector<8x128xf32>
    %c0_3 = arith.constant 0 : index
    %c0_4 = arith.constant 0 : index
    %3 = vector.load %arg3[%c0_3, %c0_4] : memref<1x128xf32, #tpu.memory_space<vmem>>, vector<1x128xf32>
    %4 = vector.broadcast %3 : vector<1x128xf32> to vector<8x128xf32>
    %5 = arith.addf %2, %4 : vector<8x128xf32>
    %cst_5 = arith.constant 0.000000e+00 : f32
    %6 = vector.broadcast %cst_5 : f32 to vector<8x128xf32>
    %7 = arith.maximumf %5, %6 : vector<8x128xf32>
    %8 = arith.truncf %7 : vector<8x128xf32> to vector<8x128xbf16>
    %c0_6 = arith.constant 0 : index
    %c0_7 = arith.constant 0 : index
    %9 = vector.load %arg4[%c0_6, %c0_7] : memref<128x128xbf16, #tpu.memory_space<vmem>>, vector<128x128xbf16>
    %cst_8 = arith.constant dense<0.000000e+00> : vector<8x128xf32>
    %10 = tpu.matmul %8, %9, %cst_8 {dimension_numbers = #tpu.dot_dimension_numbers<[1], [0], [0], [1], [0, 0, 1, 1], [], []>} : vector<8x128xbf16>, vector<128x128xbf16>, vector<8x128xf32> -> vector<8x128xf32>
    %c0_9 = arith.constant 0 : index
    %c0_10 = arith.constant 0 : index
    %11 = vector.load %arg5[%c0_9, %c0_10] : memref<1x128xf32, #tpu.memory_space<vmem>>, vector<1x128xf32>
    %12 = vector.broadcast %11 : vector<1x128xf32> to vector<8x128xf32>
    %13 = arith.addf %10, %12 : vector<8x128xf32>
    %cst_11 = arith.constant 0.000000e+00 : f32
    %14 = vector.broadcast %cst_11 : f32 to vector<8x128xf32>
    %15 = arith.maximumf %13, %14 : vector<8x128xf32>
    %16 = arith.truncf %15 : vector<8x128xf32> to vector<8x128xbf16>
    %c0_12 = arith.constant 0 : index
    %c0_13 = arith.constant 0 : index
    %17 = vector.load %arg6[%c0_12, %c0_13] : memref<128x128xbf16, #tpu.memory_space<vmem>>, vector<128x128xbf16>
    %cst_14 = arith.constant dense<0.000000e+00> : vector<8x128xf32>
    %18 = tpu.matmul %16, %17, %cst_14 {dimension_numbers = #tpu.dot_dimension_numbers<[1], [0], [0], [1], [0, 0, 1, 1], [], []>} : vector<8x128xbf16>, vector<128x128xbf16>, vector<8x128xf32> -> vector<8x128xf32>
    %c0_15 = arith.constant 0 : index
    %c0_16 = arith.constant 0 : index
    %19 = vector.load %arg7[%c0_15, %c0_16] : memref<1x128xf32, #tpu.memory_space<vmem>>, vector<1x128xf32>
    %20 = vector.broadcast %19 : vector<1x128xf32> to vector<8x128xf32>
    %21 = arith.addf %18, %20 : vector<8x128xf32>
    %cst_17 = arith.constant 0.000000e+00 : f32
    %22 = vector.broadcast %cst_17 : f32 to vector<8x128xf32>
    %23 = arith.maximumf %21, %22 : vector<8x128xf32>
    %24 = arith.truncf %23 : vector<8x128xf32> to vector<8x128xbf16>
    %c0_18 = arith.constant 0 : index
    %c0_19 = arith.constant 0 : index
    %25 = vector.load %arg8[%c0_18, %c0_19] : memref<128x128xbf16, #tpu.memory_space<vmem>>, vector<128x128xbf16>
    %cst_20 = arith.constant dense<0.000000e+00> : vector<8x128xf32>
    %26 = tpu.matmul %24, %25, %cst_20 {dimension_numbers = #tpu.dot_dimension_numbers<[1], [0], [0], [1], [0, 0, 1, 1], [], []>} : vector<8x128xbf16>, vector<128x128xbf16>, vector<8x128xf32> -> vector<8x128xf32>
    %c0_21 = arith.constant 0 : index
    %c0_22 = arith.constant 0 : index
    %27 = vector.load %arg9[%c0_21, %c0_22] : memref<1x128xf32, #tpu.memory_space<vmem>>, vector<1x128xf32>
    %28 = vector.broadcast %27 : vector<1x128xf32> to vector<8x128xf32>
    %29 = arith.addf %26, %28 : vector<8x128xf32>
    %c0_23 = arith.constant 0 : index
    %c0_24 = arith.constant 0 : index
    %30 = vector.load %arg10[%c0_23, %c0_24] : memref<8x128xf32, #tpu.memory_space<vmem>>, vector<8x128xf32>
    tpu.vector_store %arg10[%c0_23, %c0_24], %29 {strides = array<i32>} : memref<8x128xf32, #tpu.memory_space<vmem>>, vector<8x128xf32>,
    return
  }
  func.func @transform_0(%arg0: i32) -> (i32, i32) {
    %c0_i32 = arith.constant 0 : i32
    %c0_i32_0 = arith.constant 0 : i32
    return %arg0, %c0_i32 : i32, i32
  }
  func.func @transform_1(%arg0: i32) -> (i32, i32) {
    %c0_i32 = arith.constant 0 : i32
    %c0_i32_0 = arith.constant 0 : i32
    %c0_i32_1 = arith.constant 0 : i32
    return %c0_i32, %c0_i32_0 : i32, i32
  }
  func.func @transform_2(%arg0: i32) -> (i32, i32) {
    %c0_i32 = arith.constant 0 : i32
    %c0_i32_0 = arith.constant 0 : i32
    %c0_i32_1 = arith.constant 0 : i32
    return %c0_i32, %c0_i32_0 : i32, i32
  }
  func.func @transform_3(%arg0: i32) -> (i32, i32) {
    %c0_i32 = arith.constant 0 : i32
    %c0_i32_0 = arith.constant 0 : i32
    %c0_i32_1 = arith.constant 0 : i32
    return %c0_i32, %c0_i32_0 : i32, i32
  }
  func.func @transform_4(%arg0: i32) -> (i32, i32) {
    %c0_i32 = arith.constant 0 : i32
    %c0_i32_0 = arith.constant 0 : i32
    %c0_i32_1 = arith.constant 0 : i32
    return %c0_i32, %c0_i32_0 : i32, i32
  }
  func.func @transform_5(%arg0: i32) -> (i32, i32) {
    %c0_i32 = arith.constant 0 : i32
    %c0_i32_0 = arith.constant 0 : i32
    %c0_i32_1 = arith.constant 0 : i32
    return %c0_i32, %c0_i32_0 : i32, i32
  }
  func.func @transform_6(%arg0: i32) -> (i32, i32) {
    %c0_i32 = arith.constant 0 : i32
    %c0_i32_0 = arith.constant 0 : i32
    %c0_i32_1 = arith.constant 0 : i32
    return %c0_i32, %c0_i32_0 : i32, i32
  }
  func.func @transform_7(%arg0: i32) -> (i32, i32) {
    %c0_i32 = arith.constant 0 : i32
    %c0_i32_0 = arith.constant 0 : i32
    %c0_i32_1 = arith.constant 0 : i32
    return %c0_i32, %c0_i32_0 : i32, i32
  }
  func.func @transform_8(%arg0: i32) -> (i32, i32) {
    %c0_i32 = arith.constant 0 : i32
    %c0_i32_0 = arith.constant 0 : i32
    %c0_i32_1 = arith.constant 0 : i32
    return %c0_i32, %c0_i32_0 : i32, i32
  }
  func.func @transform_9(%arg0: i32) -> (i32, i32) {
    %c0_i32 = arith.constant 0 : i32
    %c0_i32_0 = arith.constant 0 : i32
    return %arg0, %c0_i32 : i32, i32
  }
}

</mosaic_0001>

<bundles_post_ra>
// kernel: tpu_custom_call.1
= control target key start
LH: loop header
LB: loop body
LE: loop exit
PB: predicated region body
PF: predicated region fallthrough
CT: control target
= control target key end

     0   :  { %14 = vsyncpa [#allocation3], 0  ;;  %s1033_s0 = inlined_call_operand.hbm [shape: bf16[8,128], index: 0, kind: input, shape index: {}]   ;;  %s1034_s1 = inlined_call_operand.hbm [shape: bf16[128,128], index: 1, kind: input, shape index: {}]   ;;  %s1035_s2 = inlined_call_operand.vmem [shape: f32[1,128], index: 2, kind: input, shape index: {}]   ;;  %s1036_s3 = inlined_call_operand.hbm [shape: bf16[128,128], index: 3, kind: input, shape index: {}]   ;;  %s1037_s4 = inlined_call_operand.vmem [shape: f32[1,128], index: 4, kind: input, shape index: {}]   ;;  %s1038_s5 = inlined_call_operand.hbm [shape: bf16[128,128], index: 5, kind: input, shape index: {}]   ;;  %s1039_s6 = inlined_call_operand.vmem [shape: f32[1,128], index: 6, kind: input, shape index: {}]   ;;  %s1040_s7 = inlined_call_operand.hbm [shape: bf16[128,128], index: 7, kind: input, shape index: {}]   ;;  %s1041_s8 = inlined_call_operand.vmem [shape: f32[1,128], index: 8, kind: input, shape index: {}]   ;;  %s1042_s9 = inlined_call_operand.hbm [shape: f32[8,128], index: 9, kind: output, shape index: {}]  }
   0x1   :  { %15 = vsyncpa [#allocation6], 0 }
   0x2   :  { %16 = vsyncpa [#allocation9], 0 }
   0x3   :  { %17 = vsyncpa [#allocation4], 0  ;;  %s891_s30 = smov [#allocation5]  }
   0x4   :  { %s33_s10 = sshll.u32 %s891_s30, 4  ;;  %s34_s10 = int_to_ptr.vmem [resolvable:$true] %s33_s10 }
   0x5   :  { %s771_s11 = scalar_lea.vmem %s34_s10, 1024  ;;  %p776_p1 = scmp.lt.s32.totalorder %s34_s10, %s34_s10 }
   0x6   :  { %p772_p0 = scmp.ne.s32.totalorder %s34_s10, %s771_s11  ;;  %p777_p2 = scmp.lt.s32.totalorder %s771_s11, %s771_s11 }
   0x8   :  { %p778_p3 = por %p777_p2, %p776_p1 }
   0xa   :  { %p779_p4 = pnand %p778_p3, %p772_p0 }
   0xc   :  { %782 = shalt.err (!%p779_p4)
}
   0xd   :  { %s892_s12 = smov 64   ;;  %s893_s13 = smov 4  }
   0xe   :  { %39 = dma.hbm_to_vmem [thread:$0]  %s1034_s1, 1024, %s34_s10, [#allocation6], %s892_s12, %s892_s12, %s893_s13  }
   0xf   :  { %s894_s16 = smov [#allocation8]   ;;  %s895_s18 = smov [#allocation2]  }
  0x10   :  { %s61_s17 = sshll.u32 %s894_s16, 4  ;;  %s24_s19 = sshll.u32 %s895_s18, 4  ;;  %s62_s17 = int_to_ptr.vmem [resolvable:$true] %s61_s17  ;;  %s25_s19 = int_to_ptr.vmem [resolvable:$true] %s24_s19 }
  0x11   :  { %s791_s20 = scalar_lea.vmem %s62_s17, 1024  ;;  %p796_p6 = scmp.lt.s32.totalorder %s62_s17, %s62_s17 }
  0x12   :  { %p792_p5 = scmp.ne.s32.totalorder %s62_s17, %s791_s20  ;;  %p797_p7 = scmp.lt.s32.totalorder %s791_s20, %s791_s20 }
  0x14   :  { %p798_p8 = por %p797_p7, %p796_p6 }
  0x16   :  { %p799_p9 = pnand %p798_p8, %p792_p5 }
  0x18   :  { %802 = shalt.err (!%p799_p9)
}
  0x19   :  { %67 = dma.hbm_to_vmem [thread:$0]  %s1038_s5, 1024, %s62_s17, [#allocation9], %s892_s12, %s892_s12, %s893_s13  }
  0x1a   :  { %s811_s1 = scalar_lea.vmem %s25_s19, 64  ;;  %p816_p11 = scmp.lt.s32.totalorder %s25_s19, %s25_s19 }
  0x1b   :  { %p812_p10 = scmp.ne.s32.totalorder %s25_s19, %s811_s1  ;;  %p817_p12 = scmp.lt.s32.totalorder %s811_s1, %s811_s1 }
  0x1d   :  { %p818_p13 = por %p817_p12, %p816_p11 }
  0x1f   :  { %p819_p0 = pnand %p818_p13, %p812_p10 }
  0x21   :  { %822 = shalt.err (!%p819_p0)
}
  0x22   :  { %27 = dma.hbm_to_vmem [thread:$0]  %s1033_s0, 64, %s25_s19, [#allocation3]  }
  0x23   :  { %s896_s25 = smov [#allocation7]   ;;  %s897_s27 = smov [#allocation10]  }
  0x24   :  { %s47_s26 = sshll.u32 %s896_s25, 4  ;;  %s75_s28 = sshll.u32 %s897_s27, 4  ;;  %s48_s26 = int_to_ptr.vmem [resolvable:$true] %s47_s26  ;;  %s76_s28 = int_to_ptr.vmem [resolvable:$true] %s75_s28 }
  0x25   :  { %s831_s29 = scalar_lea.vmem %s48_s26, 1024  ;;  %p836_p2 = scmp.lt.s32.totalorder %s48_s26, %s48_s26 }
  0x26   :  { %p832_p1 = scmp.ne.s32.totalorder %s48_s26, %s831_s29  ;;  %p837_p3 = scmp.lt.s32.totalorder %s831_s29, %s831_s29 }
  0x28   :  { %p838_p4 = por %p837_p3, %p836_p2 }
  0x2a   :  { %p839_p5 = pnand %p838_p4, %p832_p1 }
  0x2c   :  { %842 = shalt.err (!%p839_p5)
}
  0x2d   :  { %53 = dma.hbm_to_vmem [thread:$0]  %s1036_s3, 1024, %s48_s26, [#allocation6], %s892_s12, %s892_s12, %s893_s13  }
  0x2e   :  { %s851_s0 = scalar_lea.vmem %s76_s28, 1024  ;;  %p856_p7 = scmp.lt.s32.totalorder %s76_s28, %s76_s28 }
  0x2f   :  { %p852_p6 = scmp.ne.s32.totalorder %s76_s28, %s851_s0  ;;  %p857_p8 = scmp.lt.s32.totalorder %s851_s0, %s851_s0 }
  0x31   :  { %p858_p9 = por %p857_p8, %p856_p7 }
  0x33   :  { %p859_p10 = pnand %p858_p9, %p852_p6 }
  0x35   :  { %862 = shalt.err (!%p859_p10)
}
  0x36   :  { %81 = dma.hbm_to_vmem [thread:$0]  %s1040_s7, 1024, %s76_s28, [#allocation9], %s892_s12, %s892_s12, %s893_s13  }
  0x37   :  { %883 = dma.done.wait [#allocation3], 64  }
  0x38   :  { %884 = vsyncadd [#allocation3], 4294967232 }
  0x39   :  { %885 = dma.done.wait [#allocation6], 2048  }
  0x3a   :  { %886 = vsyncadd [#allocation6], 4294965248 }
  0x3b   :  { %887 = dma.done.wait [#allocation9], 2048  }
  0x3c   :  { %888 = vsyncadd [#allocation9], 4294965248  ;;  %v898_v0 = vmov 0.0   ;;  %vm899_vm0 = vmmov 0   ;;  %v731_v1 = vld [vmem:[#allocation5 + $0x38] sm:$0xff]   ;;  %v732_v2 = vld [vmem:[#allocation5 + $0x30] sm:$0xff]  }
  0x3d   :  { %641 = vmatprep.subr.bf16.mxu0 %v898_v0  ;;  %657 = vmatprep.mubr.msk.bf16.mxu0 %vm899_vm0, %v898_v0  ;;  %v733_v3 = vld [vmem:[#allocation5 + $0x28] sm:$0xff]   ;;  %v739_v4 = vld [vmem:[#allocation7 + $0x38] sm:$0xff]   ;;  %v734_v5 = vld [vmem:[#allocation5 + $0x20] sm:$0xff]   ;;  %s900_s16 = smov [#allocation11]  }
  0x3e   :  { %661 = vmatprep.subr.bf16.mxu1 %v898_v0  ;;  %677 = vmatprep.mubr.msk.bf16.mxu1 %vm899_vm0, %v898_v0  ;;  %v740_v6 = vld [vmem:[#allocation7 + $0x30] sm:$0xff]   ;;  %v735_v7 = vld [vmem:[#allocation5 + $0x18] sm:$0xff]   ;;  %v741_v8 = vld [vmem:[#allocation7 + $0x28] sm:$0xff]   ;;  %s558_s17 = sshll.u32 %s900_s16, 4  ;;  %s559_s17 = int_to_ptr.vmem [resolvable:$true] %s558_s17 }
  0x3f   :  { %642 = vmatpush3.bf16.msra.mxu0 %v731_v1  ;;  %662 = vmatpush3.bf16.msra.mxu1 %v739_v4  ;;  %v736_v9 = vld [vmem:[#allocation5 + $0x10] sm:$0xff]   ;;  %v742_v10 = vld [vmem:[#allocation7 + $0x20] sm:$0xff]   ;;  %v737_v11 = vld [vmem:[#allocation5 + $0x8] sm:$0xff]   ;;  %p868_p12 = scmp.lt.s32.totalorder %s559_s17, %s559_s17 }
  0x40   :  { %643 = vmatprep.subr.bf16.mxu0 %v898_v0  ;;  %663 = vmatprep.subr.bf16.mxu1 %v898_v0  ;;  %v743_v12 = vld [vmem:[#allocation7 + $0x18] sm:$0xff]   ;;  %v738_v13 = vld [vmem:[#allocation5] sm:$0xff]   ;;  %v744_v14 = vld [vmem:[#allocation7 + $0x10] sm:$0xff]  }
  0x41   :  { %v100_v15 = vld [vmem:[#allocation2] sm:$0xf]  ;;  %v745_v16 = vld [vmem:[#allocation7 + $0x8] sm:$0xff]   ;;  %v746_v17 = vld [vmem:[#allocation7] sm:$0xff]  }
  0x42   :  { %v747_v18 = vld [vmem:[#allocation8 + $0x38] sm:$0xff]   ;;  %v748_v19 = vld [vmem:[#allocation8 + $0x30] sm:$0xff]   ;;  %v749_v20 = vld [vmem:[#allocation8 + $0x28] sm:$0xff]  }
  0x43   :  { %644 = vmatpush3.bf16.msra.mxu0 %v732_v2  ;;  %664 = vmatpush3.bf16.msra.mxu1 %v740_v6  ;;  %v750_v21 = vld [vmem:[#allocation8 + $0x20] sm:$0xff]   ;;  %v751_v22 = vld [vmem:[#allocation8 + $0x18] sm:$0xff]   ;;  %v752_v23 = vld [vmem:[#allocation8 + $0x10] sm:$0xff]  }
  0x44   :  { %645 = vmatprep.subr.bf16.mxu0 %v898_v0  ;;  %665 = vmatprep.subr.bf16.mxu1 %v898_v0  ;;  %v569_v24 = vld [vmem:[%s1035_s2] ss:$0 sm:$0xff]  ;;  %v753_v32 = vld [vmem:[#allocation8 + $0x8] sm:$0xff]   ;;  %v754_v33 = vld [vmem:[#allocation8] sm:$0xff]  }
  0x45   :  { %v755_v34 = vld [vmem:[#allocation10 + $0x38] sm:$0xff]   ;;  %v756_v35 = vld [vmem:[#allocation10 + $0x30] sm:$0xff]   ;;  %v757_v36 = vld [vmem:[#allocation10 + $0x28] sm:$0xff]  }
  0x46   :  { %v758_v37 = vld [vmem:[#allocation10 + $0x20] sm:$0xff]   ;;  %v759_v38 = vld [vmem:[#allocation10 + $0x18] sm:$0xff]   ;;  %v760_v39 = vld [vmem:[#allocation10 + $0x10] sm:$0xff]  }
  0x47   :  { %646 = vmatpush3.bf16.msra.mxu0 %v733_v3  ;;  %666 = vmatpush3.bf16.msra.mxu1 %v741_v8  ;;  %v578_v40 = vld [vmem:[%s1037_s4] ss:$0 sm:$0xff]  ;;  %v761_v48 = vld [vmem:[#allocation10 + $0x8] sm:$0xff]   ;;  %v762_v49 = vld [vmem:[#allocation10] sm:$0xff]  }
  0x48   :  { %647 = vmatprep.subr.bf16.mxu0 %v898_v0  ;;  %667 = vmatprep.subr.bf16.mxu1 %v898_v0  ;;  %v587_v50 = vld [vmem:[%s1039_s6] ss:$0 sm:$0xff]  ;;  %s863_s6 = scalar_lea.vmem %s559_s17, 128 }
  0x49   :  { %v596_v58 = vld [vmem:[%s1041_s8] ss:$0 sm:$0xff]  ;;  %p864_p11 = scmp.ne.s32.totalorder %s559_s17, %s863_s6  ;;  %p869_p13 = scmp.lt.s32.totalorder %s863_s6, %s863_s6 }
  0x4b   :  { %648 = vmatpush3.bf16.msra.mxu0 %v734_v5  ;;  %668 = vmatpush3.bf16.msra.mxu1 %v742_v10  ;;  %p870_p0 = por %p869_p13, %p868_p12 }
  0x4c   :  { %649 = vmatprep.subr.bf16.mxu0 %v898_v0  ;;  %669 = vmatprep.subr.bf16.mxu1 %v898_v0 }
  0x4d   :  { %p871_p1 = pnand %p870_p0, %p864_p11 }
  0x4f   :  { %650 = vmatpush3.bf16.msra.mxu0 %v735_v7  ;;  %670 = vmatpush3.bf16.msra.mxu1 %v743_v12 }
  0x50   :  { %651 = vmatprep.subr.bf16.mxu0 %v898_v0  ;;  %671 = vmatprep.subr.bf16.mxu1 %v898_v0 }
  0x53   :  { %652 = vmatpush3.bf16.msra.mxu0 %v736_v9  ;;  %672 = vmatpush3.bf16.msra.mxu1 %v744_v14 }
  0x54   :  { %653 = vmatprep.subr.bf16.mxu0 %v898_v0  ;;  %673 = vmatprep.subr.bf16.mxu1 %v898_v0 }
  0x57   :  { %654 = vmatpush3.bf16.msra.mxu0 %v737_v11  ;;  %674 = vmatpush3.bf16.msra.mxu1 %v745_v16 }
  0x58   :  { %655 = vmatprep.subr.bf16.mxu0 %v898_v0  ;;  %675 = vmatprep.subr.bf16.mxu1 %v898_v0 }
  0x5b   :  { %656 = vmatpush3.bf16.msra.mxu0 %v738_v13  ;;  %676 = vmatpush3.bf16.msra.mxu1 %v746_v17 }
  0x5c   :  { %681 = vmatprep.subr.bf16.mxu0 %v898_v0  ;;  %701 = vmatprep.subr.bf16.mxu1 %v898_v0 }
  0x5e   :  { %658 = vmatmul.mubr.bf16.vlgmr.msra.gmra.mxu0 %v100_v15 }
  0x5f   :  { %697 = vmatprep.mubr.msk.bf16.mxu0 %vm899_vm0, %v898_v0  ;;  %682 = vmatpush3.bf16.msra.mxu0 %v747_v18 }
  0x60   :  { %683 = vmatprep.subr.bf16.mxu0 %v898_v0 }
  0x63   :  { %684 = vmatpush3.bf16.msra.mxu0 %v748_v19 }
  0x64   :  { %685 = vmatprep.subr.bf16.mxu0 %v898_v0 }
  0x67   :  { %686 = vmatpush3.bf16.msra.mxu0 %v749_v20 }
  0x68   :  { %687 = vmatprep.subr.bf16.mxu0 %v898_v0 }
  0x6b   :  { %688 = vmatpush3.bf16.msra.mxu0 %v750_v21 }
  0x6c   :  { %689 = vmatprep.subr.bf16.mxu0 %v898_v0 }
  0x6f   :  { %690 = vmatpush3.bf16.msra.mxu0 %v751_v22 }
  0x70   :  { %691 = vmatprep.subr.bf16.mxu0 %v898_v0 }
  0x73   :  { %692 = vmatpush3.bf16.msra.mxu0 %v752_v23 }
  0x74   :  { %693 = vmatprep.subr.bf16.mxu0 %v898_v0 }
  0x77   :  { %694 = vmatpush3.bf16.msra.mxu0 %v753_v32 }
  0x78   :  { %695 = vmatprep.subr.bf16.mxu0 %v898_v0 }
  0x7b   :  { %696 = vmatpush3.bf16.msra.mxu0 %v754_v33 }
 0x11e   :  { %v206_v25 = vpop.f32.mrf.mxu0 }
 0x11f   :  { %v207_v26 = vadd.f32 %v569_v24, %v206_v25 }
 0x120   :  { %v659_v27 = vpop.f32.mrf.mxu0 }
 0x121   :  { %v212_v28 = vmax.f32 %v207_v26, 0.0 }
 0x122   :  { %v209_v29 = vpop.f32.mrf.mxu0 }
 0x123   :  { %v213_v30 = vpack.c.bf16 %v212_v28, %v212_v28 }
 0x124   :  { %v660_v31 = vpop.f32.mrf.mxu0 }
 0x125   :  { %678 = vmatmul.mubr.bf16.vlgmr.msra.gmra.mxu1 %v213_v30 }
 0x126   :  { %717 = vmatprep.mubr.msk.bf16.mxu1 %vm899_vm0, %v898_v0  ;;  %702 = vmatpush3.bf16.msra.mxu1 %v755_v34 }
 0x127   :  { %703 = vmatprep.subr.bf16.mxu1 %v898_v0 }
 0x12a   :  { %704 = vmatpush3.bf16.msra.mxu1 %v756_v35 }
 0x12b   :  { %705 = vmatprep.subr.bf16.mxu1 %v898_v0 }
 0x12e   :  { %706 = vmatpush3.bf16.msra.mxu1 %v757_v36 }
 0x12f   :  { %707 = vmatprep.subr.bf16.mxu1 %v898_v0 }
 0x132   :  { %708 = vmatpush3.bf16.msra.mxu1 %v758_v37 }
 0x133   :  { %709 = vmatprep.subr.bf16.mxu1 %v898_v0 }
 0x136   :  { %710 = vmatpush3.bf16.msra.mxu1 %v759_v38 }
 0x137   :  { %711 = vmatprep.subr.bf16.mxu1 %v898_v0 }
 0x13a   :  { %712 = vmatpush3.bf16.msra.mxu1 %v760_v39 }
 0x13b   :  { %713 = vmatprep.subr.bf16.mxu1 %v898_v0 }
 0x13e   :  { %714 = vmatpush3.bf16.msra.mxu1 %v761_v48 }
 0x13f   :  { %715 = vmatprep.subr.bf16.mxu1 %v898_v0 }
 0x142   :  { %716 = vmatpush3.bf16.msra.mxu1 %v762_v49 }
 0x1e5   :  { %v319_v41 = vpop.f32.mrf.mxu1 }
 0x1e6   :  { %v320_v42 = vadd.f32 %v578_v40, %v319_v41 }
 0x1e7   :  { %v679_v43 = vpop.f32.mrf.mxu1 }
 0x1e8   :  { %v325_v44 = vmax.f32 %v320_v42, 0.0 }
 0x1e9   :  { %v322_v45 = vpop.f32.mrf.mxu1 }
 0x1ea   :  { %v326_v46 = vpack.c.bf16 %v325_v44, %v325_v44 }
 0x1eb   :  { %v680_v47 = vpop.f32.mrf.mxu1 }
 0x1ec   :  { %698 = vmatmul.mubr.bf16.vlgmr.msra.gmra.mxu0 %v326_v46 }
 0x2ac   :  { %v432_v51 = vpop.f32.mrf.mxu0 }
 0x2ad   :  { %v433_v52 = vadd.f32 %v587_v50, %v432_v51 }
 0x2ae   :  { %v699_v53 = vpop.f32.mrf.mxu0 }
 0x2af   :  { %v438_v54 = vmax.f32 %v433_v52, 0.0 }
 0x2b0   :  { %v435_v55 = vpop.f32.mrf.mxu0 }
 0x2b1   :  { %v439_v56 = vpack.c.bf16 %v438_v54, %v438_v54 }
 0x2b2   :  { %v700_v57 = vpop.f32.mrf.mxu0 }
 0x2b3   :  { %718 = vmatmul.mubr.bf16.vlgmr.msra.gmra.mxu1 %v439_v56 }
 0x373   :  { %v545_v59 = vpop.f32.mrf.mxu1 }
 0x374   :  { %v546_v60 = vadd.f32 %v596_v58, %v545_v59 }
 0x375   :  { %v719_v61 = vpop.f32.mrf.mxu1 }
 0x376   :  { %551 = vst [vmem:[#allocation11] sm:$0xff] %v546_v60 }
 0x377   :  { %v548_v62 = vpop.f32.mrf.mxu1 }
 0x378   :  { %874 = shalt.err (!%p871_p1)
}
 0x379   :  { %561 = dma.vmem_to_hbm [thread:$0]  %s559_s17, 128, %s1042_s9, [#allocation4]   ;;  %v720_v63 = vpop.f32.mrf.mxu1 }
 0x37a   :  { %889 = dma.done.wait [#allocation4], 128  }
 0x37b   :  { %890 = vsyncadd [#allocation4], 4294967168 }
 0x37c   :  { %565 = vsyncpa [#allocation3], 1 }
 0x37d   :  { %566 = vsyncpa [#allocation6], 1 }
 0x37e   :  { %567 = vsyncpa [#allocation9], 1 }
 0x37f   :  { %568 = vsyncpa [#allocation4], 1 }

</bundles_post_ra>
